<compile_context>
chip_gen: v6e
topology: v6e:2x2x1
jax: 0.10.0
libtpu: 0.0.40
codegen_flags: <defaults>
</compile_context>

<pallas_src>
import jax
import jax.numpy as jnp
from jax.experimental import pallas as pl
from jax.experimental.pallas import tpu as pltpu

LANE = 128


def _round_up(n, m):
    return (n + m - 1) // m * m


def _vmem_capacity_bytes():
    """Per-generation VMEM capacity; conservative fallback if unavailable."""
    try:
        cap = int(pltpu.get_tpu_info().vmem_capacity_bytes)
        if cap > 0:
            return cap
    except Exception:
        pass
    return 64 << 20  # v7x physical VMEM — the smallest of the targets


def _plan_batch(b, row_bytes, resident_bytes, sub):
    """Pick the batch tile (multiple of `sub`) and padded batch Bp = grid * tb.

    Tile derived from the VMEM budget: 2-deep pipeline of (input + output)
    tiles plus the resident combined weights, capped at 1024 rows.  Small
    batches are split into >= 2 grid steps so the "parallel" batch axis
    shards across both TensorCores on v7x.
    """
    budget = _vmem_capacity_bytes() // 2 - resident_bytes   # leave compiler headroom
    budget = max(budget, 4 * sub * row_bytes)
    tb = budget // (2 * row_bytes)                          # double-buffered tiles
    tb = max(sub, min(tb - tb % sub, 1024))
    bp = _round_up(b, sub)
    if bp <= tb:
        tb = max(sub, _round_up(pl.cdiv(bp, 2), sub))
    bp = _round_up(bp, tb)
    if bp // tb < 2:
        bp = 2 * tb                                          # ensure 2 grid steps
    return tb, bp


def ensemble_kernel(x_ref, w_ref, b_ref, o_ref):
    """Fully fused ensemble forward for one batch tile.

    x_ref : VMEM [TB, C*HW]  contiguous NCHW flatten of the input tile
    w_ref : VMEM [C*HW, Kp]  pool + weighted-mean-of-heads folded into one matrix
    b_ref : VMEM [1, Kp]     pre-combined ensemble bias (f32)
    o_ref : VMEM [TB, Kp]    ensemble logits (lane-dense, Kp % 128 == 0)
    """
    o_ref[...] = (jnp.dot(x_ref[...], w_ref[...],
                          preferred_element_type=jnp.float32)
                  + b_ref[...]).astype(o_ref.dtype)


def ensemble_forward(x, ens_weights, head_w, head_b, compute_dtype=jnp.float32):
    """x: [B, C, H, W]; ens_weights: [M]; head_w: [M, C, K]; head_b: [M, K].

    compute_dtype=jnp.bfloat16 halves HBM traffic for x / W'' on v6e/v7x
    (accumulation stays f32 on the MXU).
    """
    B, C, H, W = x.shape
    M, _, K = head_w.shape
    HW = H * W
    D = C * HW

    # --- algebraic collapse of the (linear) ensemble + pooling ---------------
    # mean_m(ew_m * (gap(x) @ W_m + b_m))
    #   == x.reshape(B, C*HW) @ repeat(sum_m((ew_m/M) W_m) / HW, HW, axis=0)
    #      + sum_m((ew_m/M) b_m)
    scale = ens_weights.astype(jnp.float32) / jnp.float32(M)           # [M]
    w_comb = jnp.einsum('m,mck->ck', scale, head_w.astype(jnp.float32))  # [C, K]
    b_comb = jnp.einsum('m,mk->k', scale, head_b.astype(jnp.float32))    # [K]
    # Fold the global-average-pool: row c*HW + hw of W'' is w_comb[c] / HW.
    w_full = jnp.repeat(w_comb / jnp.float32(HW), HW, axis=0)            # [C*HW, K]

    # Lane-dense output: pad K to a multiple of 128, slice after the call.
    Kp = _round_up(K, LANE)
    w_pad = jnp.zeros((D, Kp), compute_dtype).at[:, :K].set(
        w_full.astype(compute_dtype))
    b_pad = jnp.zeros((1, Kp), jnp.float32).at[:, :K].set(b_comb)

    # Contiguous NCHW flatten — a free reshape, no transpose / extra HBM pass.
    x_flat = x.reshape(B, D).astype(compute_dtype)

    # Batch tiling from the VMEM budget (generation-aware).
    in_bytes = jnp.dtype(compute_dtype).itemsize
    sub = 16 if in_bytes < 4 else 8                       # sublane packing
    row_bytes = D * in_bytes + Kp * 4                     # one input + output row
    resident_bytes = D * Kp * in_bytes + Kp * 4           # W'' + bias stay resident
    tb, Bp = _plan_batch(B, row_bytes, resident_bytes, sub)
    if Bp != B:
        x_flat = jnp.zeros((Bp, D), compute_dtype).at[:B].set(x_flat)
    grid = (Bp // tb,)

    cap = _vmem_capacity_bytes()
    vmem_limit = int(min(cap * 3 // 4, 96 << 20))

    out = pl.pallas_call(
        ensemble_kernel,
        out_shape=jax.ShapeDtypeStruct((Bp, Kp), jnp.float32),
        grid=grid,
        in_specs=[
            pl.BlockSpec((tb, D), lambda i: (i, 0)),      # streamed input tile
            pl.BlockSpec((D, Kp), lambda i: (0, 0)),      # resident combined head
            pl.BlockSpec((1, Kp), lambda i: (0, 0)),      # resident combined bias
        ],
        out_specs=pl.BlockSpec((tb, Kp), lambda i: (i, 0)),
        compiler_params=pltpu.CompilerParams(
            dimension_semantics=("parallel",),
            vmem_limit_bytes=vmem_limit),
    )(x_flat, w_pad, b_pad)

    return out[:B, :K]


def ensemble_reference(x, ens_weights, head_w, head_b):
    """Plain-JAX mirror of Ensemble.forward with the synthetic members."""
    pooled = x.mean(axis=(2, 3))                                     # [B, C]
    outs = jnp.einsum('bc,mck->mbk', pooled, head_w) + head_b[:, None, :]
    w = ens_weights.reshape(-1, 1, 1)                                # [M, 1, 1]
    return jnp.mean(outs * w, axis=0)                                # [B, K]


if __name__ == "__main__":
    B, C, H, W = 2, 4, 16, 16      # NCHW input, like the PyTorch module
    num_classes = 8
    num_models = 3                 # len(config['models']) / config['names']

    key = jax.random.PRNGKey(0)
    kx, kw, kb = jax.random.split(key, 3)

    x = jax.random.normal(kx, (B, C, H, W), dtype=jnp.float32)
    head_w = jax.random.normal(kw, (num_models, C, num_classes),
                               dtype=jnp.float32) * 0.1
    head_b = jax.random.normal(kb, (num_models, num_classes),
                               dtype=jnp.float32) * 0.01
    # config['weights'] equivalent
    ens_weights = jnp.array([0.5, 0.3, 0.2], dtype=jnp.float32)

    ref = ensemble_reference(x, ens_weights, head_w, head_b)

    # f32 path (bit-close to the reference).
    out = jax.block_until_ready(ensemble_forward(x, ens_weights, head_w, head_b))
    assert out.shape == (B, num_classes)
    assert jnp.allclose(out, ref, atol=1e-4, rtol=1e-4), (out, ref)

    # bf16 input/weight path (the mem-bound lever on v6e/v7x), f32 accumulation.
    out_bf16 = jax.block_until_ready(
        ensemble_forward(x, ens_weights, head_w, head_b,
                         compute_dtype=jnp.bfloat16))
    assert out_bf16.shape == (B, num_classes)
    assert jnp.allclose(out_bf16, ref, atol=2e-2, rtol=2e-2), (out_bf16, ref)

    print("KERNEL_OK")
</pallas_src>

<mosaic_0001>
module attributes {stable_mosaic.version = 11 : i64} {
  func.func @ensemble_kernel(%arg0: i32, %arg1: memref<8x1024xf32, #tpu.memory_space<vmem>>, %arg2: memref<1024x128xf32, #tpu.memory_space<vmem>>, %arg3: memref<1x128xf32, #tpu.memory_space<vmem>>, %arg4: memref<8x128xf32, #tpu.memory_space<vmem>>) attributes {dimension_semantics = [#tpu.dimension_semantics<parallel>], iteration_bounds = array<i64: 2>, scalar_prefetch = 0 : i64, scratch_operands = 0 : i64, tpu.core_type = #tpu.core_type<tc>, window_params = [{transform_indices = @transform_0, window_bounds = array<i64: 8, 1024>}, {pipeline_mode = #tpu.pipeline_mode<synchronous>, transform_indices = @transform_1, window_bounds = array<i64: 1024, 128>}, {pipeline_mode = #tpu.pipeline_mode<synchronous>, transform_indices = @transform_2, window_bounds = array<i64: 1, 128>}, {transform_indices = @transform_3, window_bounds = array<i64: 8, 128>}]} {
    %c0 = arith.constant 0 : index
    %c0_0 = arith.constant 0 : index
    %0 = vector.load %arg1[%c0, %c0_0] : memref<8x1024xf32, #tpu.memory_space<vmem>>, vector<8x1024xf32>
    %c0_1 = arith.constant 0 : index
    %c0_2 = arith.constant 0 : index
    %1 = vector.load %arg2[%c0_1, %c0_2] : memref<1024x128xf32, #tpu.memory_space<vmem>>, vector<1024x128xf32>
    %cst = arith.constant dense<0.000000e+00> : vector<8x128xf32>
    %2 = tpu.matmul %0, %1, %cst {dimension_numbers = #tpu.dot_dimension_numbers<[1], [0], [0], [1], [0, 0, 1, 1], [], []>} : vector<8x1024xf32>, vector<1024x128xf32>, vector<8x128xf32> -> vector<8x128xf32>
    %c0_3 = arith.constant 0 : index
    %c0_4 = arith.constant 0 : index
    %3 = vector.load %arg3[%c0_3, %c0_4] : memref<1x128xf32, #tpu.memory_space<vmem>>, vector<1x128xf32>
    %4 = vector.broadcast %3 : vector<1x128xf32> to vector<8x128xf32>
    %5 = arith.addf %2, %4 : vector<8x128xf32>
    %c0_5 = arith.constant 0 : index
    %c0_6 = arith.constant 0 : index
    %6 = vector.load %arg4[%c0_5, %c0_6] : memref<8x128xf32, #tpu.memory_space<vmem>>, vector<8x128xf32>
    tpu.vector_store %arg4[%c0_5, %c0_6], %5 {strides = array<i32>} : memref<8x128xf32, #tpu.memory_space<vmem>>, vector<8x128xf32>,
    return
  }
  func.func @transform_0(%arg0: i32) -> (i32, i32) {
    %c0_i32 = arith.constant 0 : i32
    %c0_i32_0 = arith.constant 0 : i32
    return %arg0, %c0_i32 : i32, i32
  }
  func.func @transform_1(%arg0: i32) -> (i32, i32) {
    %c0_i32 = arith.constant 0 : i32
    %c0_i32_0 = arith.constant 0 : i32
    %c0_i32_1 = arith.constant 0 : i32
    return %c0_i32, %c0_i32_0 : i32, i32
  }
  func.func @transform_2(%arg0: i32) -> (i32, i32) {
    %c0_i32 = arith.constant 0 : i32
    %c0_i32_0 = arith.constant 0 : i32
    %c0_i32_1 = arith.constant 0 : i32
    return %c0_i32, %c0_i32_0 : i32, i32
  }
  func.func @transform_3(%arg0: i32) -> (i32, i32) {
    %c0_i32 = arith.constant 0 : i32
    %c0_i32_0 = arith.constant 0 : i32
    return %arg0, %c0_i32 : i32, i32
  }
}

</mosaic_0001>

<bundles_post_ra>
// kernel: tpu_custom_call.1
= control target key start
LH: loop header
LB: loop body
LE: loop exit
PB: predicated region body
PF: predicated region fallthrough
CT: control target
= control target key end

     0   :  { %8 = vsyncpa [#allocation3], 0  ;;  %s1253_s0 = inlined_call_operand.hbm [shape: f32[16,1024], index: 0, kind: input, shape index: {}]   ;;  %s1254_s1 = inlined_call_operand.hbm [shape: f32[1024,128], index: 1, kind: input, shape index: {}]   ;;  %s1255_s2 = inlined_call_operand.vmem [shape: f32[1,128], index: 2, kind: input, shape index: {}]   ;;  %s1256_s3 = inlined_call_operand.hbm [shape: f32[16,128], index: 3, kind: output, shape index: {}]  }
   0x1   :  { %10 = vsyncpa [#allocation3 + $0x1], 0 }
   0x2   :  { %11 = vsyncpa [#allocation6], 0 }
   0x3   :  { %12 = vsyncpa [#allocation4], 0 }
   0x4   :  { %14 = vsyncpa [#allocation4 + $0x1], 0  ;;  %s1085_s12 = smov 0   ;;  %s1087_s13 = smov 0  }
   0x5   :  { %s1089_s14 = smov 0   ;;  %s1091_s15 = smov 0  }
   0x6 LB: > { %s1106_s16 = sadd.s32 4294967295, %s1058_s15   ;;  %s720_s17 = sadd.s32 4294967294, %s1058_s15   ;;  %s1058_s15 = sphi %s1091_s15, %s1278_s15   ;;  %s1054_s14 = sphi %s1089_s14, %s1277_s14   ;;  %s1050_s13 = sphi %s1087_s13, %s1276_s13   ;;  %s1046_s12 = sphi %s1085_s12, %s1275_s12  }
   0x7   : > { %p40_p0 = scmp.ne.s32.totalorder %s1050_s13, %s1046_s12  ;;  %p1257_p1 = scmp.eq.s32.totalorder %s1106_s16, 0 }
   0x8   : > { %p112_p3 = scmp.eq.s32.totalorder %s720_s17, 1  ;;  %p721_p5 = scmp.ge.s32.totalorder %s1058_s15, 1 }
   0x9   : > { %p1115_p4 = por %p1257_p1, %p40_p0  ;;  %p119_p7 = scmp.lt.s32.totalorder %s1058_s15, 3 }
   0xa   : > { %p1120_p6 = por %p112_p3, %p40_p0  ;;  %s1060_s21 = smov [#allocation5]  }
   0xb   : > { %s1261_s18 = scalar_select %p1115_p4, 1, 0 }
   0xc   : > { %s1262_s19 = scalar_select %p1120_p6, 1, 0 }
   0xd   : > { %p1125_p8 = pnand %p721_p5, %p119_p7  ;;  %s131_s22 = sshll.u32 %s1060_s21, 4  ;;  %s132_s22 = int_to_ptr.vmem [resolvable:$true] %s131_s22 }
   0xe   : > { %s1139_s24 = sadd.s32 1, %s1058_s15   ;;  %s27_s25 = sadd.s32 1, %s1054_s14 }
   0xf   : > { %s1263_s20 = scalar_select %p1125_p8, 1, 0 }
  0x10   : > { %p885_p9 = pneg %p1125_p8  ;;  %s24_s26 = ssub.s32 %s1058_s15, %s1139_s24 }
  0x11   : > { %s947_s27 = scalar_lea.vmem %s132_s22, 16384  ;;  %p955_p5 = scmp.lt.s32.totalorder %s132_s22, %s132_s22 }
  0x12   : > { %p1134_p11 = pnand %p885_p9, %p1257_p1  ;;  %p948_p13 = scmp.ne.s32.totalorder %s132_s22, %s947_s27 }
  0x13   : > { %p956_p7 = scmp.lt.s32.totalorder %s947_s27, %s947_s27 }
  0x14   : > { %p938_p12 = pneg %p1134_p11 }
  0x15   : > { %p957_p10 = por %p956_p7, %p955_p5 }
  0x16   : > { %p950_p0 = pnand %p948_p13, %p938_p12 }
  0x18   : > { %p951_p3 = pneg %p950_p0 }
  0x1a   : > { %p958_p2 = pnand %p957_p10, %p951_p3 }
  0x1c   : > { %961 = shalt.err (!%p958_p2)
}
  0x1d   : > { %s1061_s28 = smov 128   ;;  %s1062_s29 = smov 8  }
  0x1e   : > { %888 = dma.hbm_to_vmem [thread:$0]  (!%p1134_p11), %s1254_s1, 16384, %s132_s22, [#allocation6], %s1061_s28, %s1061_s28, %s1062_s29  }
  0x1f   : > { %p25_p9 = scmp.eq.s32.totalorder %s24_s26, 0  ;;  %p34_p12 = scmp.ne.s32.totalorder %s1054_s14, %s1050_s13 }
  0x20   : > { %p35_p10 = scmp.eq.s32.totalorder %s1058_s15, 0  ;;  %p898_p2 = scmp.lt.s32.totalorder %s1058_s15, 2 }
  0x21   : > { %s1156_s5 = scalar_select %p25_p9, %s1054_s14, %s27_s25  }
  0x22   : > { %p36_p13 = por %p35_p10, %p34_p12  ;;  %p1265_p0 = scmp.eq.s32.totalorder %s1106_s16, 1 }
  0x23   : > { %s148_s7 = sand.u32 1, %s1054_s14   ;;  %s736_s8 = sshll.u32 %s1058_s15, 10 }
  0x24   : > { %p1160_p3 = por %p1265_p0, %p34_p12  ;;  %s724_s9 = sshll.u32 %s148_s7, 6 }
  0x25   : > { %s1169_s17 = scalar_lea.hbm %s1253_s0, %s736_s8  ;;  %s152_s21 = scalar_lea.vmem [#allocation2], %s724_s9 }
  0x26   : > { %s1266_s6 = scalar_select %p1160_p3, 1, 0 }
  0x27   : > { %s160_s22 = sshll.u32 %s152_s21, 4  ;;  %p1171_p11 = pnand %p898_p2, %p36_p13  ;;  %s161_s22 = int_to_ptr.vmem [resolvable:$true] %s160_s22 }
  0x28   : > { %s149_s25 = scalar_lea.sflag [#allocation3], %s148_s7  ;;  %s962_s26 = scalar_lea.hbm %s1169_s17, 1024 }
  0x29   : > { %p963_p5 = scmp.ne.s32.totalorder %s1169_s17, %s962_s26  ;;  %p964_p7 = pneg %p1171_p11 }
  0x2a   : > { %s967_s29 = scalar_lea.hbm %s1253_s0, 2048  ;;  %p968_p10 = scmp.lt.s32.totalorder %s1169_s17, %s1253_s0 }
  0x2b   : > { %p965_p9 = pnand %p964_p7, %p963_p5  ;;  %p969_p2 = scmp.lt.s32.totalorder %s967_s29, %s962_s26 }
  0x2d   : > { %p966_p12 = pneg %p965_p9  ;;  %p970_p13 = por %p969_p2, %p968_p10 }
  0x2f   : > { %p971_p0 = pnand %p970_p13, %p966_p12 }
  0x31   : > { %974 = shalt.err (!%p971_p0)
}
  0x32   : > { %s975_s8 = scalar_lea.vmem %s161_s22, 1024  ;;  %s1063_s7 = smov [#allocation2]  }
  0x33   : > { %p976_p1 = scmp.ne.s32.totalorder %s161_s22, %s975_s8  ;;  %s980_s9 = sshll.u32 %s1063_s7, 4  ;;  %s981_s9 = int_to_ptr.vmem [resolvable:$false] %s980_s9 }
  0x34   : > { %s982_s10 = scalar_lea.vmem %s981_s9, 2048  ;;  %p983_p5 = scmp.lt.s32.totalorder %s161_s22, %s981_s9 }
  0x35   : > { %p978_p6 = pnand %p976_p1, %p964_p7  ;;  %p984_p9 = scmp.lt.s32.totalorder %s982_s10, %s975_s8 }
  0x37   : > { %p979_p3 = pneg %p978_p6  ;;  %p985_p4 = por %p984_p9, %p983_p5 }
  0x39   : > { %p986_p8 = pnand %p985_p4, %p979_p3 }
  0x3b   : > { %989 = shalt.err (!%p986_p8)
}
  0x3c   : > { %892 = dma.hbm_to_vmem [thread:$0]  (!%p1171_p11), %s1169_s17, 1024, %s161_s22, %s149_s25  }
  0x3d   : > { %p1268_p12 = scmp.ne.s32.totalorder %s1263_s20, 0 }
  0x3e   : > { %s1192_s11 = sand.u32 (!%p1268_p12), 1, %s1050_s13   ;;  %p1269_p1 = scmp.ne.s32.totalorder (!%p1268_p12), %s1261_s18, 0 }
  0x3f   : > { %169 = sbr.rel (%p1268_p12) target bundleno = 355 (0x163), region = 32  ;;  %s728_s21 = sshll.u32 (!%p1268_p12), %s1192_s11, 6 }
  0x40   : > { %s172_s26 = scalar_lea.sflag (!%p1268_p12), [#allocation3], %s1192_s11  ;;  %s1196_s27 = scalar_lea.vmem (!%p1268_p12), [#allocation2], %s728_s21 }
  0x44   : > { %1033 = dma.done.wait (%p1269_p1), %s172_s26, 1024  }
  0x45   : > { %1035 = vsyncadd (%p1269_p1), %s172_s26, 4294966272  ;;  %p1270_p4 = scmp.eq.s32.totalorder %s1106_s16, 0 }
  0x47   : > { %1037 = dma.done.wait (%p1270_p4), [#allocation6], 16384   ;;  %p1271_p6 = pmov %p1270_p4 }
  0x48   : > { %v241_v0 = vld [vmem:[#allocation5 + $0xf8] sm:$0xff]  ;;  %v240_v4 = vld [vmem:[#allocation5 + $0xf0] sm:$0xff]  ;;  %v239_v8 = vld [vmem:[#allocation5 + $0xe8] sm:$0xff]  ;;  %s730_s17 = sshll.u32 %s1192_s11, 3  ;;  %s733_s22 = sshll.u32 %s1106_s16, 7 }
  0x49   : > { %1039 = vsyncadd (%p1271_p6), [#allocation6], 4294950912  ;;  %v273_v1 = vld [vmem:[#allocation5 + $0x1f8] sm:$0xff]  ;;  %737 = vmatprep.subr.mxu0 %v241_v0  ;;  %v272_v5 = vld [vmem:[#allocation5 + $0x1f0] sm:$0xff]  ;;  %s201_s23 = scalar_lea.vmem [#allocation7], %s730_s17  ;;  %s638_s30 = scalar_lea.hbm %s1256_s3, %s733_s22 }
  0x4a   : > { %v225_v2 = vld [vmem:[#allocation5 + $0x78] sm:$0xff]  ;;  %772 = vmatprep.subr.mxu1 %v273_v1  ;;  %v224_v6 = vld [vmem:[#allocation5 + $0x70] sm:$0xff]  ;;  %v271_v9 = vld [vmem:[#allocation5 + $0x1e8] sm:$0xff]  ;;  %s640_s25 = sshll.u32 %s201_s23, 4  ;;  %s627_s4 = scalar_lea.sflag [#allocation4], %s1192_s11  ;;  %s641_s25 = int_to_ptr.vmem [resolvable:$true] %s640_s25 }
  0x4b   : > { %v257_v3 = vld [vmem:[#allocation5 + $0x178] sm:$0xff]  ;;  %738 = vmatpush3.msra.mxu0 %v225_v2  ;;  %v256_v7 = vld [vmem:[#allocation5 + $0x170] sm:$0xff]  ;;  %v223_v10 = vld [vmem:[#allocation5 + $0x68] sm:$0xff]  ;;  %s990_s8 = scalar_lea.vmem %s641_s25, 128  ;;  %p1272_p3 = scmp.ne.s32.totalorder %s1266_s6, 0 }
  0x4c   : > { %773 = vmatpush3.msra.mxu1 %v257_v3  ;;  %739 = vmatprep.subr.mxu0 %v240_v4  ;;  %v255_v11 = vld [vmem:[#allocation5 + $0x168] sm:$0xff]  ;;  %v238_v12 = vld [vmem:[#allocation5 + $0xe0] sm:$0xff]  ;;  %v237_v16 = vld [vmem:[#allocation5 + $0xd8] sm:$0xff]  ;;  %p991_p8 = scmp.ne.s32.totalorder %s641_s25, %s990_s8  ;;  %s1064_s7 = smov [#allocation7]  }
  0x4d   : > { %774 = vmatprep.subr.mxu1 %v272_v5  ;;  %740 = vmatpush3.msra.mxu0 %v224_v6  ;;  %v270_v13 = vld [vmem:[#allocation5 + $0x1e0] sm:$0xff]  ;;  %v269_v17 = vld [vmem:[#allocation5 + $0x1d8] sm:$0xff]  ;;  %v236_v20 = vld [vmem:[#allocation5 + $0xd0] sm:$0xff]  ;;  %s994_s9 = sshll.u32 %s1064_s7, 4  ;;  %s995_s9 = int_to_ptr.vmem [resolvable:$false] %s994_s9 }
  0x4e   : > { %775 = vmatpush3.msra.mxu1 %v256_v7  ;;  %741 = vmatprep.subr.mxu0 %v239_v8  ;;  %v222_v14 = vld [vmem:[#allocation5 + $0x60] sm:$0xff]  ;;  %v221_v18 = vld [vmem:[#allocation5 + $0x58] sm:$0xff]  ;;  %v268_v21 = vld [vmem:[#allocation5 + $0x1d0] sm:$0xff]  ;;  %p992_p11 = pnand %p991_p8, %p1272_p3  ;;  %s996_s16 = scalar_lea.vmem %s995_s9, 256 }
  0x4f   : > { %776 = vmatprep.subr.mxu1 %v271_v9  ;;  %v254_v15 = vld [vmem:[#allocation5 + $0x160] sm:$0xff]  ;;  %742 = vmatpush3.msra.mxu0 %v223_v10  ;;  %v253_v19 = vld [vmem:[#allocation5 + $0x158] sm:$0xff]  ;;  %v220_v22 = vld [vmem:[#allocation5 + $0x50] sm:$0xff]  ;;  %p997_p10 = scmp.lt.s32.totalorder %s641_s25, %s995_s9  ;;  %p998_p2 = scmp.lt.s32.totalorder %s996_s16, %s990_s8 }
  0x50   : > { %777 = vmatpush3.msra.mxu1 %v255_v11  ;;  %743 = vmatprep.subr.mxu0 %v238_v12  ;;  %v252_v23 = vld [vmem:[#allocation5 + $0x150] sm:$0xff]  ;;  %v235_v24 = vld [vmem:[#allocation5 + $0xc8] sm:$0xff]  ;;  %v234_v28 = vld [vmem:[#allocation5 + $0xc0] sm:$0xff]  ;;  %p993_p7 = pneg %p992_p11 }
  0x51   : > { %778 = vmatprep.subr.mxu1 %v270_v13  ;;  %744 = vmatpush3.msra.mxu0 %v222_v14  ;;  %v267_v25 = vld [vmem:[#allocation5 + $0x1c8] sm:$0xff]  ;;  %v266_v29 = vld [vmem:[#allocation5 + $0x1c0] sm:$0xff]  ;;  %v233_v32 = vld [vmem:[#allocation5 + $0xb8] sm:$0xff]  ;;  %p999_p13 = por %p998_p2, %p997_p10 }
  0x52   : > { %779 = vmatpush3.msra.mxu1 %v254_v15  ;;  %745 = vmatprep.subr.mxu0 %v237_v16  ;;  %v219_v26 = vld [vmem:[#allocation5 + $0x48] sm:$0xff]  ;;  %v218_v30 = vld [vmem:[#allocation5 + $0x40] sm:$0xff]  ;;  %v265_v33 = vld [vmem:[#allocation5 + $0x1b8] sm:$0xff] }
  0x53   : > { %780 = vmatprep.subr.mxu1 %v269_v17  ;;  %746 = vmatpush3.msra.mxu0 %v221_v18  ;;  %v251_v27 = vld [vmem:[#allocation5 + $0x148] sm:$0xff]  ;;  %v250_v31 = vld [vmem:[#allocation5 + $0x140] sm:$0xff]  ;;  %v217_v34 = vld [vmem:[#allocation5 + $0x38] sm:$0xff]  ;;  %p1000_p0 = pnand %p999_p13, %p993_p7 }
  0x54   : > { %781 = vmatpush3.msra.mxu1 %v253_v19  ;;  %747 = vmatprep.subr.mxu0 %v236_v20  ;;  %v249_v35 = vld [vmem:[#allocation5 + $0x138] sm:$0xff]  ;;  %v232_v36 = vld [vmem:[#allocation5 + $0xb0] sm:$0xff]  ;;  %v231_v40 = vld [vmem:[#allocation5 + $0xa8] sm:$0xff] }
  0x55   : > { %782 = vmatprep.subr.mxu1 %v268_v21  ;;  %748 = vmatpush3.msra.mxu0 %v220_v22  ;;  %v264_v37 = vld [vmem:[#allocation5 + $0x1b0] sm:$0xff]  ;;  %v263_v41 = vld [vmem:[#allocation5 + $0x1a8] sm:$0xff]  ;;  %v230_v44 = vld [vmem:[#allocation5 + $0xa0] sm:$0xff] }
  0x56   : > { %783 = vmatpush3.msra.mxu1 %v252_v23  ;;  %749 = vmatprep.subr.mxu0 %v235_v24  ;;  %v216_v38 = vld [vmem:[#allocation5 + $0x30] sm:$0xff]  ;;  %v215_v42 = vld [vmem:[#allocation5 + $0x28] sm:$0xff]  ;;  %v262_v45 = vld [vmem:[#allocation5 + $0x1a0] sm:$0xff] }
  0x57   : > { %784 = vmatprep.subr.mxu1 %v267_v25  ;;  %750 = vmatpush3.msra.mxu0 %v219_v26  ;;  %v248_v39 = vld [vmem:[#allocation5 + $0x130] sm:$0xff]  ;;  %v247_v43 = vld [vmem:[#allocation5 + $0x128] sm:$0xff]  ;;  %v214_v46 = vld [vmem:[#allocation5 + $0x20] sm:$0xff] }
  0x58   : > { %785 = vmatpush3.msra.mxu1 %v251_v27  ;;  %751 = vmatprep.subr.mxu0 %v234_v28  ;;  %v246_v47 = vld [vmem:[#allocation5 + $0x120] sm:$0xff]  ;;  %v229_v48 = vld [vmem:[#allocation5 + $0x98] sm:$0xff]  ;;  %v228_v52 = vld [vmem:[#allocation5 + $0x90] sm:$0xff] }
  0x59   : > { %786 = vmatprep.subr.mxu1 %v266_v29  ;;  %752 = vmatpush3.msra.mxu0 %v218_v30  ;;  %v261_v49 = vld [vmem:[#allocation5 + $0x198] sm:$0xff]  ;;  %v260_v53 = vld [vmem:[#allocation5 + $0x190] sm:$0xff]  ;;  %v227_v56 = vld [vmem:[#allocation5 + $0x88] sm:$0xff] }
  0x5a   : > { %787 = vmatpush3.msra.mxu1 %v250_v31  ;;  %753 = vmatprep.subr.mxu0 %v233_v32  ;;  %v213_v50 = vld [vmem:[#allocation5 + $0x18] sm:$0xff]  ;;  %v212_v54 = vld [vmem:[#allocation5 + $0x10] sm:$0xff]  ;;  %v259_v57 = vld [vmem:[#allocation5 + $0x188] sm:$0xff] }
  0x5b   : > { %788 = vmatprep.subr.mxu1 %v265_v33  ;;  %754 = vmatpush3.msra.mxu0 %v217_v34  ;;  %v245_v51 = vld [vmem:[#allocation5 + $0x118] sm:$0xff]  ;;  %v244_v55 = vld [vmem:[#allocation5 + $0x110] sm:$0xff]  ;;  %v211_v58 = vld [vmem:[#allocation5 + $0x8] sm:$0xff] }
  0x5c   : > { %789 = vmatpush3.msra.mxu1 %v249_v35  ;;  %755 = vmatprep.subr.mxu0 %v232_v36  ;;  %v243_v59 = vld [vmem:[#allocation5 + $0x108] sm:$0xff]  ;;  %v226_v60 = vld [vmem:[#allocation5 + $0x80] sm:$0xff]  ;;  %v205_v2 = vld [vmem:[%s1196_s27 + $0x18] sm:$0xff] }
  0x5d   : > { %790 = vmatprep.subr.mxu1 %v264_v37  ;;  %756 = vmatpush3.msra.mxu0 %v216_v38  ;;  %v258_v61 = vld [vmem:[#allocation5 + $0x180] sm:$0xff]  ;;  %v203_v63 = vld [vmem:[%s1196_s27 + $0x8] sm:$0xff]  ;;  %v305_v3 = vld [vmem:[#allocation5 + $0x2f8] sm:$0xff] }
  0x5e   : > { %791 = vmatpush3.msra.mxu1 %v248_v39  ;;  %757 = vmatprep.subr.mxu0 %v231_v40  ;;  %v210_v62 = vld [vmem:[#allocation5] sm:$0xff]  ;;  %v337_v4 = vld [vmem:[#allocation5 + $0x3f8] sm:$0xff]  ;;  %v204_v5 = vld [vmem:[%s1196_s27 + $0x10] sm:$0xff] }
  0x5f   : > { %792 = vmatprep.subr.mxu1 %v263_v41  ;;  %758 = vmatpush3.msra.mxu0 %v215_v42  ;;  %v242_v0 = vld [vmem:[#allocation5 + $0x100] sm:$0xff]  ;;  %v289_v6 = vld [vmem:[#allocation5 + $0x278] sm:$0xff]  ;;  %v304_v8 = vld [vmem:[#allocation5 + $0x2f0] sm:$0xff] }
  0x60   : > { %793 = vmatpush3.msra.mxu1 %v247_v43  ;;  %759 = vmatprep.subr.mxu0 %v230_v44  ;;  %v202_v1 = vld [vmem:[%s1196_s27] sm:$0xff]  ;;  %v321_v7 = vld [vmem:[#allocation5 + $0x378] sm:$0xff]  ;;  %v336_v9 = vld [vmem:[#allocation5 + $0x3f0] sm:$0xff] }
  0x61   : > { %794 = vmatprep.subr.mxu1 %v262_v45  ;;  %760 = vmatpush3.msra.mxu0 %v214_v46  ;;  %v288_v10 = vld [vmem:[#allocation5 + $0x270] sm:$0xff]  ;;  %v303_v12 = vld [vmem:[#allocation5 + $0x2e8] sm:$0xff]  ;;  %v302_v16 = vld [vmem:[#allocation5 + $0x2e0] sm:$0xff] }
  0x62   : > { %795 = vmatpush3.msra.mxu1 %v246_v47  ;;  %761 = vmatprep.subr.mxu0 %v229_v48  ;;  %v320_v11 = vld [vmem:[#allocation5 + $0x370] sm:$0xff]  ;;  %v335_v13 = vld [vmem:[#allocation5 + $0x3e8] sm:$0xff]  ;;  %v334_v17 = vld [vmem:[#allocation5 + $0x3e0] sm:$0xff] }
  0x63   : > { %796 = vmatprep.subr.mxu1 %v261_v49  ;;  %762 = vmatpush3.msra.mxu0 %v213_v50  ;;  %v287_v14 = vld [vmem:[#allocation5 + $0x268] sm:$0xff]  ;;  %v286_v18 = vld [vmem:[#allocation5 + $0x260] sm:$0xff]  ;;  %v301_v20 = vld [vmem:[#allocation5 + $0x2d8] sm:$0xff] }
  0x64   : > { %797 = vmatpush3.msra.mxu1 %v245_v51  ;;  %763 = vmatprep.subr.mxu0 %v228_v52  ;;  %v319_v15 = vld [vmem:[#allocation5 + $0x368] sm:$0xff]  ;;  %v318_v19 = vld [vmem:[#allocation5 + $0x360] sm:$0xff]  ;;  %v333_v21 = vld [vmem:[#allocation5 + $0x3d8] sm:$0xff] }
  0x65   : > { %798 = vmatprep.subr.mxu1 %v260_v53  ;;  %764 = vmatpush3.msra.mxu0 %v212_v54  ;;  %v285_v22 = vld [vmem:[#allocation5 + $0x258] sm:$0xff]  ;;  %v300_v24 = vld [vmem:[#allocation5 + $0x2d0] sm:$0xff]  ;;  %v299_v28 = vld [vmem:[#allocation5 + $0x2c8] sm:$0xff] }
  0x66   : > { %799 = vmatpush3.msra.mxu1 %v244_v55  ;;  %765 = vmatprep.subr.mxu0 %v227_v56  ;;  %v317_v23 = vld [vmem:[#allocation5 + $0x358] sm:$0xff]  ;;  %v332_v25 = vld [vmem:[#allocation5 + $0x3d0] sm:$0xff]  ;;  %v331_v29 = vld [vmem:[#allocation5 + $0x3c8] sm:$0xff] }
  0x67   : > { %800 = vmatprep.subr.mxu1 %v259_v57  ;;  %766 = vmatpush3.msra.mxu0 %v211_v58  ;;  %v284_v26 = vld [vmem:[#allocation5 + $0x250] sm:$0xff]  ;;  %v283_v30 = vld [vmem:[#allocation5 + $0x248] sm:$0xff]  ;;  %v298_v32 = vld [vmem:[#allocation5 + $0x2c0] sm:$0xff] }
  0x68   : > { %801 = vmatpush3.msra.mxu1 %v243_v59  ;;  %767 = vmatprep.subr.mxu0 %v226_v60  ;;  %v316_v27 = vld [vmem:[#allocation5 + $0x350] sm:$0xff]  ;;  %v315_v31 = vld [vmem:[#allocation5 + $0x348] sm:$0xff]  ;;  %v330_v33 = vld [vmem:[#allocation5 + $0x3c0] sm:$0xff] }
  0x69   : > { %802 = vmatprep.subr.mxu1 %v258_v61  ;;  %768 = vmatpush3.msra.mxu0 %v210_v62  ;;  %v282_v34 = vld [vmem:[#allocation5 + $0x240] sm:$0xff]  ;;  %v297_v36 = vld [vmem:[#allocation5 + $0x2b8] sm:$0xff]  ;;  %v296_v40 = vld [vmem:[#allocation5 + $0x2b0] sm:$0xff] }
  0x6a   : > { %409 = vmatprep.mubr.f32.mxu0 %v203_v63  ;;  %803 = vmatpush3.msra.mxu1 %v242_v0  ;;  %v314_v35 = vld [vmem:[#allocation5 + $0x340] sm:$0xff]  ;;  %v329_v37 = vld [vmem:[#allocation5 + $0x3b8] sm:$0xff]  ;;  %v328_v41 = vld [vmem:[#allocation5 + $0x3b0] sm:$0xff] }
  0x6b   : > { %410 = vmatmul.mubr.f32.vlgmr.msra.gmra.mxu0 %v202_v1  ;;  %479 = vmatprep.mubr.f32.mxu1 %v205_v2  ;;  %v281_v38 = vld [vmem:[#allocation5 + $0x238] sm:$0xff]  ;;  %v280_v42 = vld [vmem:[#allocation5 + $0x230] sm:$0xff]  ;;  %v295_v44 = vld [vmem:[#allocation5 + $0x2a8] sm:$0xff] }
  0x6c   : > { %807 = vmatprep.subr.mxu0 %v305_v3  ;;  %842 = vmatprep.subr.mxu1 %v337_v4  ;;  %v313_v39 = vld [vmem:[#allocation5 + $0x338] sm:$0xff]  ;;  %v312_v43 = vld [vmem:[#allocation5 + $0x330] sm:$0xff]  ;;  %v327_v45 = vld [vmem:[#allocation5 + $0x3a8] sm:$0xff] }
  0x6d   : > { %480 = vmatmul.mubr.f32.vlgmr.msra.gmra.mxu1 %v204_v5  ;;  %808 = vmatpush3.msra.mxu0 %v289_v6  ;;  %v279_v46 = vld [vmem:[#allocation5 + $0x228] sm:$0xff]  ;;  %v294_v48 = vld [vmem:[#allocation5 + $0x2a0] sm:$0xff]  ;;  %v293_v52 = vld [vmem:[#allocation5 + $0x298] sm:$0xff] }
  0x6e   : > { %843 = vmatpush3.msra.mxu1 %v321_v7  ;;  %809 = vmatprep.subr.mxu0 %v304_v8  ;;  %v311_v47 = vld [vmem:[#allocation5 + $0x328] sm:$0xff]  ;;  %v326_v49 = vld [vmem:[#allocation5 + $0x3a0] sm:$0xff]  ;;  %v325_v53 = vld [vmem:[#allocation5 + $0x398] sm:$0xff] }
  0x6f   : > { %844 = vmatprep.subr.mxu1 %v336_v9  ;;  %810 = vmatpush3.msra.mxu0 %v288_v10  ;;  %v278_v50 = vld [vmem:[#allocation5 + $0x220] sm:$0xff]  ;;  %v277_v54 = vld [vmem:[#allocation5 + $0x218] sm:$0xff]  ;;  %v292_v56 = vld [vmem:[#allocation5 + $0x290] sm:$0xff] }
  0x70   : > { %845 = vmatpush3.msra.mxu1 %v320_v11  ;;  %811 = vmatprep.subr.mxu0 %v303_v12  ;;  %v310_v51 = vld [vmem:[#allocation5 + $0x320] sm:$0xff]  ;;  %v309_v55 = vld [vmem:[#allocation5 + $0x318] sm:$0xff]  ;;  %v324_v57 = vld [vmem:[#allocation5 + $0x390] sm:$0xff] }
  0x71   : > { %846 = vmatprep.subr.mxu1 %v335_v13  ;;  %812 = vmatpush3.msra.mxu0 %v287_v14  ;;  %v276_v58 = vld [vmem:[#allocation5 + $0x210] sm:$0xff]  ;;  %v291_v60 = vld [vmem:[#allocation5 + $0x288] sm:$0xff]  ;;  %v290_v0 = vld [vmem:[#allocation5 + $0x280] sm:$0xff] }
  0x72   : > { %847 = vmatpush3.msra.mxu1 %v319_v15  ;;  %813 = vmatprep.subr.mxu0 %v302_v16  ;;  %v308_v59 = vld [vmem:[#allocation5 + $0x310] sm:$0xff]  ;;  %v323_v61 = vld [vmem:[#allocation5 + $0x388] sm:$0xff]  ;;  %v322_v1 = vld [vmem:[#allocation5 + $0x380] sm:$0xff] }
  0x73   : > { %848 = vmatprep.subr.mxu1 %v334_v17  ;;  %814 = vmatpush3.msra.mxu0 %v286_v18  ;;  %v275_v62 = vld [vmem:[#allocation5 + $0x208] sm:$0xff]  ;;  %v274_v2 = vld [vmem:[#allocation5 + $0x200] sm:$0xff]  ;;  %v209_v5 = vld [vmem:[%s1196_s27 + $0x38] sm:$0xff] }
  0x74   : > { %849 = vmatpush3.msra.mxu1 %v318_v19  ;;  %815 = vmatprep.subr.mxu0 %v301_v20  ;;  %v307_v63 = vld [vmem:[#allocation5 + $0x308] sm:$0xff]  ;;  %v306_v4 = vld [vmem:[#allocation5 + $0x300] sm:$0xff]  ;;  %v208_v7 = vld [vmem:[%s1196_s27 + $0x30] sm:$0xff] }
  0x75   : > { %850 = vmatprep.subr.mxu1 %v333_v21  ;;  %816 = vmatpush3.msra.mxu0 %v285_v22  ;;  %v207_v3 = vld [vmem:[%s1196_s27 + $0x28] sm:$0xff]  ;;  %v206_v6 = vld [vmem:[%s1196_s27 + $0x20] sm:$0xff] }
  0x76   : > { %851 = vmatpush3.msra.mxu1 %v317_v23  ;;  %817 = vmatprep.subr.mxu0 %v300_v24  ;;  %v731_v12 = vld [vmem:[%s1255_s2] ss:$0 sm:$0xff] }
  0x77   : > { %852 = vmatprep.subr.mxu1 %v332_v25  ;;  %818 = vmatpush3.msra.mxu0 %v284_v26 }
  0x78   : > { %853 = vmatpush3.msra.mxu1 %v316_v27  ;;  %819 = vmatprep.subr.mxu0 %v299_v28 }
  0x79   : > { %854 = vmatprep.subr.mxu1 %v331_v29  ;;  %820 = vmatpush3.msra.mxu0 %v283_v30 }
  0x7a   : > { %855 = vmatpush3.msra.mxu1 %v315_v31  ;;  %821 = vmatprep.subr.mxu0 %v298_v32 }
  0x7b   : > { %856 = vmatprep.subr.mxu1 %v330_v33  ;;  %822 = vmatpush3.msra.mxu0 %v282_v34 }
  0x7c   : > { %857 = vmatpush3.msra.mxu1 %v314_v35  ;;  %823 = vmatprep.subr.mxu0 %v297_v36 }
  0x7d   : > { %858 = vmatprep.subr.mxu1 %v329_v37  ;;  %824 = vmatpush3.msra.mxu0 %v281_v38 }
  0x7e   : > { %859 = vmatpush3.msra.mxu1 %v313_v39  ;;  %825 = vmatprep.subr.mxu0 %v296_v40 }
  0x7f   : > { %860 = vmatprep.subr.mxu1 %v328_v41  ;;  %826 = vmatpush3.msra.mxu0 %v280_v42 }
  0x80   : > { %861 = vmatpush3.msra.mxu1 %v312_v43  ;;  %827 = vmatprep.subr.mxu0 %v295_v44 }
  0x81   : > { %862 = vmatprep.subr.mxu1 %v327_v45  ;;  %828 = vmatpush3.msra.mxu0 %v279_v46 }
  0x82   : > { %863 = vmatpush3.msra.mxu1 %v311_v47  ;;  %829 = vmatprep.subr.mxu0 %v294_v48 }
  0x83   : > { %864 = vmatprep.subr.mxu1 %v326_v49  ;;  %830 = vmatpush3.msra.mxu0 %v278_v50 }
  0x84   : > { %865 = vmatpush3.msra.mxu1 %v310_v51  ;;  %831 = vmatprep.subr.mxu0 %v293_v52 }
  0x85   : > { %866 = vmatprep.subr.mxu1 %v325_v53  ;;  %832 = vmatpush3.msra.mxu0 %v277_v54 }
  0x86   : > { %867 = vmatpush3.msra.mxu1 %v309_v55  ;;  %833 = vmatprep.subr.mxu0 %v292_v56 }
  0x87   : > { %868 = vmatprep.subr.mxu1 %v324_v57  ;;  %834 = vmatpush3.msra.mxu0 %v276_v58 }
  0x88   : > { %869 = vmatpush3.msra.mxu1 %v308_v59  ;;  %835 = vmatprep.subr.mxu0 %v291_v60 }
  0x89   : > { %870 = vmatprep.subr.mxu1 %v323_v61  ;;  %836 = vmatpush3.msra.mxu0 %v275_v62 }
  0x8a   : > { %871 = vmatpush3.msra.mxu1 %v307_v63  ;;  %837 = vmatprep.subr.mxu0 %v290_v0 }
  0x8b   : > { %872 = vmatprep.subr.mxu1 %v322_v1  ;;  %838 = vmatpush3.msra.mxu0 %v274_v2 }
  0x8c   : > { %549 = vmatprep.mubr.f32.mxu0 %v207_v3  ;;  %873 = vmatpush3.msra.mxu1 %v306_v4 }
  0x8d   : > { %619 = vmatprep.mubr.f32.mxu1 %v209_v5  ;;  %550 = vmatmul.mubr.f32.vlgmr.msra.gmra.mxu0 %v206_v6 }
  0x8e   : > { %620 = vmatmul.mubr.f32.vlgmr.msra.gmra.mxu1 %v208_v7 }
 0x12b   : > { %v769_v8 = vpop.f32.mrf.mxu0 }
 0x12d   : > { %v804_v9 = vpop.f32.mrf.mxu1  ;;  %v770_v10 = vpop.f32.mrf.mxu0 }
 0x12e   : > { %v771_v11 = vadd.f32 %v770_v10, %v769_v8 }
 0x12f   : > { %v805_v13 = vpop.f32.mrf.mxu1 }
 0x130   : > { %v412_v14 = vadd.f32 %v771_v11, %v731_v12  ;;  %v806_v15 = vadd.f32 %v805_v13, %v804_v9 }
 0x132   : > { %v482_v20 = vadd.f32 %v806_v15, %v412_v14 }
 0x14d   : > { %v839_v16 = vpop.f32.mrf.mxu0 }
 0x14e   : > { %v874_v17 = vpop.f32.mrf.mxu1 }
 0x14f   : > { %v840_v18 = vpop.f32.mrf.mxu0 }
 0x150   : > { %v875_v19 = vpop.f32.mrf.mxu1  ;;  %v841_v21 = vadd.f32 %v840_v18, %v839_v16 }
 0x151   : > { %v876_v23 = vadd.f32 %v875_v19, %v874_v17 }
 0x152   : > { %v552_v22 = vadd.f32 %v841_v21, %v482_v20 }
 0x154   : > { %v622_v24 = vadd.f32 %v876_v23, %v552_v22 }
 0x156   : > { %625 = vst [vmem:[%s201_s23] sm:$0xff] %v622_v24 }
 0x157   : > { %1003 = shalt.err (!%p1000_p0)
}
 0x158   : > { %s1004_s10 = scalar_lea.hbm %s638_s30, 128  ;;  %s1008_s26 = scalar_lea.hbm %s1256_s3, 256 }
 0x159   : > { %p1005_p5 = scmp.ne.s32.totalorder %s638_s30, %s1004_s10  ;;  %p1009_p1 = scmp.lt.s32.totalorder %s638_s30, %s1256_s3 }
 0x15a   : > { %p1010_p4 = scmp.lt.s32.totalorder %s1008_s26, %s1004_s10 }
 0x15b   : > { %p1006_p9 = pnand %p1005_p5, %p1272_p3 }
 0x15c   : > { %p1011_p6 = por %p1010_p4, %p1009_p1 }
 0x15d   : > { %p1007_p12 = pneg %p1006_p9 }
 0x15f   : > { %p1012_p8 = pnand %p1011_p6, %p1007_p12 }
 0x161   : > { %1015 = shalt.err (!%p1012_p8)
}
 0x162   : > { %883 = dma.vmem_to_hbm [thread:$0]  (%p1272_p3), %s641_s25, 128, %s638_s30, %s627_s4  }
 0x163 PF: > { %s652_s20 = sand.u32 1, %s1046_s12   ;;  %p1273_p11 = scmp.ne.s32.totalorder %s1262_s19, 0 }
 0x164   : > { %p1274_p7 = scmp.ge.s32.totalorder %s1058_s15, 2  ;;  %s653_s17 = scalar_lea.sflag [#allocation4], %s652_s20 }
 0x166   : > { %p894_p10 = pnand %p1274_p7, %p1273_p11 }
 0x168   : > { %p895_p2 = pneg %p894_p10 }
 0x16a   : > { %1041 = dma.done.wait (%p895_p2), %s653_s17, 128  }
 0x16b   : > { %1043 = vsyncadd (%p895_p2), %s653_s17, 4294967168  ;;  %p17_p13 = scmp.ge.s32.totalorder %s1139_s24, 4   ;;  %s1275_s12 = smov %s1050_s13 }
 0x16c   : > { %s1276_s13 = smov %s1054_s14  ;;  %s1277_s14 = smov %s1156_s5 }
 0x16d   : > { %s1278_s15 = smov %s1139_s24  ;;  %19 = sbr.rel (!%p17_p13) target bundleno = 6 (0x6), region = 81 }
 0x172   :  { %658 = vsyncpa [#allocation3], 1 }
 0x173   :  { %660 = vsyncpa [#allocation3 + $0x1], 1 }
 0x174   :  { %661 = vsyncpa [#allocation6], 1 }
 0x175   :  { %662 = vsyncpa [#allocation4], 1 }
 0x176   :  { %664 = vsyncpa [#allocation4 + $0x1], 1 }

</bundles_post_ra>
